<compile_context>
chip_gen: v6e
topology: v6e:2x2x1
jax: 0.10.0
libtpu: 0.0.40
codegen_flags: <defaults>
</compile_context>

<pallas_src>
import math

import jax
import jax.numpy as jnp
from jax.experimental import pallas as pl
from jax.experimental.pallas import tpu as pltpu


def _cast_kernel(x_ref, o_ref):
    # Elementwise cast to float32 (identity copy if already f32).
    o_ref[...] = x_ref[...].astype(jnp.float32)


def _round_up(x, m):
    return ((x + m - 1) // m) * m


_SMALL_OUT_BYTES = 1 << 20        # below ~1 MiB of f32 output: skip Pallas
_TARGET_BLOCK_BYTES = 4 << 20     # ~4 MiB of f32 output per grid step


def passer_forward(feats, metadata=None, *, force_pallas=False):
    """JAX/Pallas equivalent of Passer.forward: returns feats cast to float32.

    `metadata` is accepted for API parity but unused (same as the PyTorch
    module). `force_pallas=True` bypasses the small-input / non-aligned
    fallbacks (used for testing the kernel paths).
    """
    orig_shape = feats.shape
    total = int(math.prod(orig_shape)) if orig_shape else 1

    # Tiny tensors: launch + DMA setup overhead dwarfs the HBM traffic.
    if total == 0 or (not force_pallas and total * 4 < _SMALL_OUT_BYTES):
        return feats.astype(jnp.float32)

    # ---- Lane-dense reflatten: view as (rows, lanes) ----
    # Require lanes % 128 == 0 and rows % 8 == 0 so every block is perfectly
    # (8,128)-aligned and all stores are full unmasked vsts.
    lanes = None
    for cand in (1024, 512, 256, 128):
        if total % (cand * 8) == 0:
            lanes = cand
            break

    flat = feats.reshape(-1)
    if lanes is None:
        if not force_pallas:
            # Pad+kernel+slice costs 3 HBM passes vs. 1 for XLA's contiguous
            # convert — fall back instead.
            return feats.astype(jnp.float32)
        lanes = 512
        padded_total = _round_up(total, lanes * 8)
        flat = jnp.pad(flat, (0, padded_total - total))
    rows = flat.shape[0] // lanes
    x2d = flat.reshape(rows, lanes)

    # ---- Byte-targeted row tiling ----
    # ~4 MiB of f32 output per block; double-buffered input (<= 4 B/elem) +
    # output (4 B/elem) stays ~16 MiB worst case -> fits every chip's VMEM.
    target_rows = max(8, _TARGET_BLOCK_BYTES // (lanes * 4))
    tile_rows = min(rows, target_rows)
    tile_rows = _round_up(tile_rows, 8)
    n_blocks = pl.cdiv(rows, tile_rows)

    # Give both v7x TensorCores work when there is enough data to split.
    if n_blocks < 2 and rows > 8:
        tile_rows = _round_up(pl.cdiv(rows, 2), 8)
        n_blocks = pl.cdiv(rows, tile_rows)

    # TODO(synk): pipeline_mode=pl.Buffered(3) on the input spec is a minor
    # (~few %) extra win if the input DMA ever shows up exposed in traces.
    out2d = pl.pallas_call(
        _cast_kernel,
        out_shape=jax.ShapeDtypeStruct((rows, lanes), jnp.float32),
        grid_spec=pltpu.PrefetchScalarGridSpec(
            num_scalar_prefetch=0,
            grid=(n_blocks,),
            in_specs=[pl.BlockSpec((tile_rows, lanes), lambda i: (i, 0))],
            out_specs=pl.BlockSpec((tile_rows, lanes), lambda i: (i, 0)),
        ),
        compiler_params=pltpu.CompilerParams(
            dimension_semantics=("parallel",),
            vmem_limit_bytes=48 * 1024 * 1024,
        ),
    )(x2d)

    out_flat = out2d.reshape(-1)
    if out_flat.shape[0] != total:
        out_flat = out_flat[:total]
    return out_flat.reshape(orig_shape)


if __name__ == "__main__":
    key = jax.random.PRNGKey(0)
    k1, k2, k3 = jax.random.split(key, 3)

    # 1) Small NCHW input (module-spec scale), kernel forced so the Pallas
    #    path is exercised at this shape: 2048 elems -> (16, 128) view,
    #    two parallel (8, 128) blocks.
    feats_small = jax.random.normal(k1, (2, 4, 16, 16), dtype=jnp.bfloat16)
    out_small = jax.block_until_ready(passer_forward(feats_small, force_pallas=True))
    assert out_small.shape == feats_small.shape
    assert out_small.dtype == jnp.float32
    assert bool(jnp.allclose(out_small, feats_small.astype(jnp.float32)))

    # 1b) Same input through the default path (small-input XLA fallback).
    out_small_fb = jax.block_until_ready(passer_forward(feats_small))
    assert out_small_fb.dtype == jnp.float32
    assert bool(jnp.allclose(out_small_fb, feats_small.astype(jnp.float32)))

    # 2) Medium NCHW input -> Pallas lane-dense cast kernel (2 MiB of f32
    #    output, reflattened to 512 x 1024, two parallel grid steps).
    feats_med = jax.random.normal(k2, (8, 16, 32, 128), dtype=jnp.bfloat16)
    out_med = jax.block_until_ready(passer_forward(feats_med, force_pallas=True))
    assert out_med.shape == feats_med.shape
    assert out_med.dtype == jnp.float32
    assert bool(jnp.allclose(out_med, feats_med.astype(jnp.float32)))

    # 3) Odd, non-lane-aligned shape with the kernel forced -> exercises the
    #    pad-and-slice path (default path would fall back to XLA convert).
    feats_odd = jax.random.normal(k3, (3, 7, 61), dtype=jnp.float32)
    out_odd = jax.block_until_ready(passer_forward(feats_odd, force_pallas=True))
    assert out_odd.shape == feats_odd.shape
    assert out_odd.dtype == jnp.float32
    assert bool(jnp.allclose(out_odd, feats_odd))

    print("KERNEL_OK")
</pallas_src>

<mosaic_0001>
module attributes {stable_mosaic.version = 11 : i64} {
  func.func @_cast_kernel(%arg0: i32, %arg1: memref<8x256xbf16, #tpu.memory_space<vmem>>, %arg2: memref<8x256xf32, #tpu.memory_space<vmem>>) attributes {dimension_semantics = [#tpu.dimension_semantics<parallel>], iteration_bounds = array<i64: 1>, scalar_prefetch = 0 : i64, scratch_operands = 0 : i64, tpu.core_type = #tpu.core_type<tc>, window_params = [{transform_indices = @transform_0, window_bounds = array<i64: 8, 256>}, {transform_indices = @transform_1, window_bounds = array<i64: 8, 256>}]} {
    %c0 = arith.constant 0 : index
    %c0_0 = arith.constant 0 : index
    %0 = vector.load %arg1[%c0, %c0_0] : memref<8x256xbf16, #tpu.memory_space<vmem>>, vector<8x256xbf16>
    %1 = arith.extf %0 : vector<8x256xbf16> to vector<8x256xf32>
    %c0_1 = arith.constant 0 : index
    %c0_2 = arith.constant 0 : index
    %2 = vector.load %arg2[%c0_1, %c0_2] : memref<8x256xf32, #tpu.memory_space<vmem>>, vector<8x256xf32>
    tpu.vector_store %arg2[%c0_1, %c0_2], %1 {strides = array<i32>} : memref<8x256xf32, #tpu.memory_space<vmem>>, vector<8x256xf32>,
    return
  }
  func.func @transform_0(%arg0: i32) -> (i32, i32) {
    %c0_i32 = arith.constant 0 : i32
    %c0_i32_0 = arith.constant 0 : i32
    return %arg0, %c0_i32 : i32, i32
  }
  func.func @transform_1(%arg0: i32) -> (i32, i32) {
    %c0_i32 = arith.constant 0 : i32
    %c0_i32_0 = arith.constant 0 : i32
    return %arg0, %c0_i32 : i32, i32
  }
}

</mosaic_0001>

<bundles_post_ra>
// kernel: tpu_custom_call.1
= control target key start
LH: loop header
LB: loop body
LE: loop exit
PB: predicated region body
PF: predicated region fallthrough
CT: control target
= control target key end

     0   :  { %6 = vsyncpa [#allocation3], 0  ;;  %s105_s0 = inlined_call_operand.hbm [shape: bf16[8,256], index: 0, kind: input, shape index: {}]   ;;  %s106_s1 = inlined_call_operand.hbm [shape: f32[8,256], index: 1, kind: output, shape index: {}]  }
   0x1   :  { %7 = vsyncpa [#allocation4], 0  ;;  %s87_s6 = smov [#allocation2]  }
   0x2   :  { %s14_s7 = sshll.u32 %s87_s6, 4  ;;  %s15_s7 = int_to_ptr.vmem [resolvable:$true] %s14_s7 }
   0x3   :  { %s51_s8 = scalar_lea.vmem %s15_s7, 128  ;;  %p56_p1 = scmp.lt.s32.totalorder %s15_s7, %s15_s7 }
   0x4   :  { %p52_p0 = scmp.ne.s32.totalorder %s15_s7, %s51_s8  ;;  %p57_p2 = scmp.lt.s32.totalorder %s51_s8, %s51_s8 }
   0x6   :  { %p58_p3 = por %p57_p2, %p56_p1 }
   0x8   :  { %p59_p4 = pnand %p58_p3, %p52_p0 }
   0xa   :  { %62 = shalt.err (!%p59_p4)
}
   0xb   :  { %17 = dma.hbm_to_vmem [thread:$0]  %s105_s0, 128, %s15_s7, [#allocation3]  }
   0xc   :  { %83 = dma.done.wait [#allocation3], 128  }
   0xd   :  { %84 = vsyncadd [#allocation3], 4294967168  ;;  %s88_s11 = smov [#allocation5]   ;;  %v21_v0 = vld [vmem:[#allocation2] sm:$0xff] }
   0xe   :  { %s32_s12 = sshll.u32 %s88_s11, 4  ;;  %v22_v1 = vunpack.c.l.bf16 %v21_v0  ;;  %v23_v2 = vunpack.c.h.bf16 %v21_v0  ;;  %s33_s12 = int_to_ptr.vmem [resolvable:$true] %s32_s12 }
   0xf   :  { %s63_s13 = scalar_lea.vmem %s33_s12, 256  ;;  %p68_p6 = scmp.lt.s32.totalorder %s33_s12, %s33_s12 }
  0x10   :  { %24 = vst [vmem:[#allocation5] sm:$0xff] %v22_v1  ;;  %25 = vst [vmem:[#allocation5 + $0x8] sm:$0xff] %v23_v2  ;;  %p64_p5 = scmp.ne.s32.totalorder %s33_s12, %s63_s13  ;;  %p69_p7 = scmp.lt.s32.totalorder %s63_s13, %s63_s13 }
  0x12   :  { %p70_p8 = por %p69_p7, %p68_p6 }
  0x14   :  { %p71_p9 = pnand %p70_p8, %p64_p5 }
  0x16   :  { %74 = shalt.err (!%p71_p9)
}
  0x17   :  { %35 = dma.vmem_to_hbm [thread:$0]  %s33_s12, 256, %s106_s1, [#allocation4]  }
  0x18   :  { %85 = dma.done.wait [#allocation4], 256  }
  0x19   :  { %86 = vsyncadd [#allocation4], 4294967040 }
  0x1a   :  { %39 = vsyncpa [#allocation3], 1 }
  0x1b   :  { %40 = vsyncpa [#allocation4], 1 }

</bundles_post_ra>
